<compile_context>
chip_gen: v7x
topology: tpu7x:2x2x1
jax: 0.10.0
libtpu: 0.0.40
codegen_flags: <defaults>
</compile_context>

<pallas_src>
import numpy as np
import jax
import jax.numpy as jnp
from jax.experimental import pallas as pl
from jax.experimental.pallas import tpu as pltpu

_VMEM = pl.BlockSpec(memory_space=pltpu.MemorySpace.VMEM)
_SMEM = pl.BlockSpec(memory_space=pltpu.MemorySpace.SMEM)


# ----------------------------------------------------------------------------
# Fused kernel bodies (one per branch)
# ----------------------------------------------------------------------------
def _linear_prelu(x, w_aug, alpha):
    """y = prelu(x @ W + b, alpha).

    x:     (B, K) f32
    w_aug: (K+1, N) f32, bias packed in the last row
    alpha: scalar f32 (read from SMEM)
    K is tiny & static -> unrolled VPU broadcast-FMA, no MXU.
    """
    B, K = x.shape
    N = w_aug.shape[1]
    y = jnp.broadcast_to(w_aug[K:K + 1, :], (B, N))            # bias row
    for k in range(K):                                         # K = 3, unrolled
        y = y + x[:, k:k + 1] * w_aug[k:k + 1, :]              # outer-product FMA
    return jnp.where(y >= 0.0, y, alpha * y)                   # PReLU


def _branch_true_kernel(x_ref, w_ref, a_ref, o_ref):
    # linear1 (3->2) + view (no-op) + PReLU(0.3), fully fused.
    o_ref[...] = _linear_prelu(x_ref[...], w_ref[...], a_ref[0])


def _branch_false_kernel(x_ref, w_ref, a_ref, o_ref):
    # linear2 (3->10) + PReLU(0.4) + Softmax(dim=-1), fully fused.
    y = _linear_prelu(x_ref[...], w_ref[...], a_ref[0])
    m = jnp.max(y, axis=-1, keepdims=True)
    e = jnp.exp(y - m)
    s = jnp.sum(e, axis=-1, keepdims=True)
    o_ref[...] = e * pl.reciprocal(s, approx=False)            # EUP recip, VPU mul


def _run_branch(kernel, x, w_aug, alpha):
    B = x.shape[0]
    N = w_aug.shape[1]
    return pl.pallas_call(
        kernel,
        out_shape=jax.ShapeDtypeStruct((B, N), jnp.float32),
        in_specs=[_VMEM, _VMEM, _SMEM],     # x, packed weight+bias, alpha scalar
        out_specs=_VMEM,
    )(x, w_aug, alpha)


# ----------------------------------------------------------------------------
# One-time parameter preparation (hoisted out of the per-call path)
# ----------------------------------------------------------------------------
def prepare_params(params):
    """Pre-transpose / pre-cast weights, pack bias as last row, shape alphas."""
    def pack(w, b):  # w: (N, K) torch-layout, b: (N,)
        return jnp.concatenate(
            [w.T.astype(jnp.float32), b.reshape(1, -1).astype(jnp.float32)],
            axis=0)                                            # (K+1, N)
    return {
        'w1_aug': pack(params['w1'], params['b1']),            # (4, 2)
        'w2_aug': pack(params['w2'], params['b2']),            # (4, 10)
        'a1': jnp.reshape(params['a1'], (1,)).astype(jnp.float32),
        'a2': jnp.reshape(params['a2'], (1,)).astype(jnp.float32),
    }


# ----------------------------------------------------------------------------
# Forward (wrapper)
# ----------------------------------------------------------------------------
def forward_pallas(x, prepped, condition: bool):
    # `condition` is a trace-time Python bool (branches have different output
    # shapes), matching PyTorch's `if condition:` semantics.
    if x.dtype != jnp.float32:
        x = x.astype(jnp.float32)
    if condition:
        # x.view(x.size(0), -1) is an identity reshape on a 2-D result: dropped.
        return _run_branch(_branch_true_kernel, x, prepped['w1_aug'], prepped['a1'])
    return _run_branch(_branch_false_kernel, x, prepped['w2_aug'], prepped['a2'])


# ----------------------------------------------------------------------------
# Pure-JAX reference (for correctness check)
# ----------------------------------------------------------------------------
def forward_reference(x, params, condition: bool):
    def prelu(v, a):
        return jnp.where(v >= 0.0, v, a * v)

    if condition:
        y = x @ params['w1'].T + params['b1']
        y = y.reshape(y.shape[0], -1)
        return prelu(y, params['a1'])
    y = x @ params['w2'].T + params['b2']
    y = prelu(y, params['a2'])
    return jax.nn.softmax(y, axis=-1)


# ----------------------------------------------------------------------------
# Deterministic parameter init (shapes match the PyTorch module)
# ----------------------------------------------------------------------------
def init_params(key):
    ks = jax.random.split(key, 4)
    return {
        'w1': jax.random.normal(ks[0], (2, 3), jnp.float32) * 0.5,   # Linear(3, 2)
        'b1': jax.random.normal(ks[1], (2,), jnp.float32) * 0.1,
        'w2': jax.random.normal(ks[2], (10, 3), jnp.float32) * 0.5,  # Linear(3, 10)
        'b2': jax.random.normal(ks[3], (10,), jnp.float32) * 0.1,
        'a1': jnp.float32(0.3),                                      # PReLU(init=0.3)
        'a2': jnp.float32(0.4),                                      # PReLU(init=0.4)
    }


if __name__ == "__main__":
    key = jax.random.PRNGKey(0)
    pkey, xkey = jax.random.split(key)
    params = init_params(pkey)
    prepped = prepare_params(params)                 # one-time prep, reused per call
    x = jax.random.normal(xkey, (2, 3), jnp.float32)  # batch=2, features=3

    out_true = jax.block_until_ready(forward_pallas(x, prepped, condition=True))
    out_false = jax.block_until_ready(forward_pallas(x, prepped, condition=False))
    assert out_true.shape == (2, 2), out_true.shape
    assert out_false.shape == (2, 10), out_false.shape

    ref_true = jax.block_until_ready(forward_reference(x, params, True))
    ref_false = jax.block_until_ready(forward_reference(x, params, False))
    np.testing.assert_allclose(np.asarray(out_true), np.asarray(ref_true),
                               rtol=1e-4, atol=1e-5)
    np.testing.assert_allclose(np.asarray(out_false), np.asarray(ref_false),
                               rtol=1e-4, atol=1e-5)
    np.testing.assert_allclose(np.asarray(out_false).sum(-1), np.ones(2),
                               rtol=1e-4, atol=1e-5)
    print("KERNEL_OK")
</pallas_src>

<mosaic_0001>
module attributes {stable_mosaic.version = 11 : i64} {
  func.func @_branch_true_kernel(%arg0: memref<2x3xf32, #tpu.memory_space<vmem>>, %arg1: memref<4x2xf32, #tpu.memory_space<vmem>>, %arg2: memref<1xf32, #tpu.memory_space<smem>>, %arg3: memref<2x2xf32, #tpu.memory_space<vmem>>) attributes {dimension_semantics = [], scalar_prefetch = 0 : i64, scratch_operands = 0 : i64, tpu.core_type = #tpu.core_type<tc>} {
    %c0 = arith.constant 0 : index
    %c0_0 = arith.constant 0 : index
    %0 = vector.load %arg0[%c0, %c0_0] : memref<2x3xf32, #tpu.memory_space<vmem>>, vector<2x3xf32>
    %c0_1 = arith.constant 0 : index
    %c0_2 = arith.constant 0 : index
    %1 = vector.load %arg1[%c0_1, %c0_2] : memref<4x2xf32, #tpu.memory_space<vmem>>, vector<4x2xf32>
    %c0_3 = arith.constant 0 : index
    %2 = memref.load %arg2[%c0_3] : memref<1xf32, #tpu.memory_space<smem>>
    %3 = vector.extract_strided_slice %1 {offsets = [3, 0], sizes = [1, 2], strides = [1, 1]} : vector<4x2xf32> to vector<1x2xf32>
    %4 = vector.shape_cast %3 : vector<1x2xf32> to vector<1x2xf32>
    %5 = vector.broadcast %4 : vector<1x2xf32> to vector<2x2xf32>
    %6 = vector.extract_strided_slice %0 {offsets = [0, 0], sizes = [2, 1], strides = [1, 1]} : vector<2x3xf32> to vector<2x1xf32>
    %7 = vector.extract_strided_slice %1 {offsets = [0, 0], sizes = [1, 2], strides = [1, 1]} : vector<4x2xf32> to vector<1x2xf32>
    %8 = vector.broadcast %6 : vector<2x1xf32> to vector<2x2xf32>
    %9 = vector.broadcast %7 : vector<1x2xf32> to vector<2x2xf32>
    %10 = arith.mulf %8, %9 : vector<2x2xf32>
    %11 = arith.addf %5, %10 : vector<2x2xf32>
    %12 = vector.extract_strided_slice %0 {offsets = [0, 1], sizes = [2, 1], strides = [1, 1]} : vector<2x3xf32> to vector<2x1xf32>
    %13 = vector.extract_strided_slice %1 {offsets = [1, 0], sizes = [1, 2], strides = [1, 1]} : vector<4x2xf32> to vector<1x2xf32>
    %14 = vector.broadcast %12 : vector<2x1xf32> to vector<2x2xf32>
    %15 = vector.broadcast %13 : vector<1x2xf32> to vector<2x2xf32>
    %16 = arith.mulf %14, %15 : vector<2x2xf32>
    %17 = arith.addf %11, %16 : vector<2x2xf32>
    %18 = vector.extract_strided_slice %0 {offsets = [0, 2], sizes = [2, 1], strides = [1, 1]} : vector<2x3xf32> to vector<2x1xf32>
    %19 = vector.extract_strided_slice %1 {offsets = [2, 0], sizes = [1, 2], strides = [1, 1]} : vector<4x2xf32> to vector<1x2xf32>
    %20 = vector.broadcast %18 : vector<2x1xf32> to vector<2x2xf32>
    %21 = vector.broadcast %19 : vector<1x2xf32> to vector<2x2xf32>
    %22 = arith.mulf %20, %21 : vector<2x2xf32>
    %23 = arith.addf %17, %22 : vector<2x2xf32>
    %cst = arith.constant 0.000000e+00 : f32
    %24 = vector.broadcast %cst : f32 to vector<2x2xf32>
    %25 = arith.cmpf oge, %23, %24 : vector<2x2xf32>
    %26 = vector.broadcast %2 : f32 to vector<2x2xf32>
    %27 = arith.mulf %26, %23 : vector<2x2xf32>
    %28 = arith.select %25, %23, %27 : vector<2x2xi1>, vector<2x2xf32>
    %c0_4 = arith.constant 0 : index
    %c0_5 = arith.constant 0 : index
    %29 = vector.load %arg3[%c0_4, %c0_5] : memref<2x2xf32, #tpu.memory_space<vmem>>, vector<2x2xf32>
    tpu.vector_store %arg3[%c0_4, %c0_5], %28 {strides = array<i32>} : memref<2x2xf32, #tpu.memory_space<vmem>>, vector<2x2xf32>,
    return
  }
}

</mosaic_0001>

<bundles_post_ra>
// kernel: tpu_custom_call.1
= control target key start
LH: loop header
LB: loop body
LE: loop exit
PB: predicated region body
PF: predicated region fallthrough
CT: control target
= control target key end

     0   :  { %v106_v1 = vmov 0   ;;  %v107_v2 = vmov 2   ;;  %s151_s0 = inlined_call_operand.vmem [shape: f32[2,3], index: 0, kind: input, shape index: {}]   ;;  %s152_s1 = inlined_call_operand.vmem [shape: f32[4,2], index: 1, kind: input, shape index: {}]   ;;  %s153_s2 = inlined_call_operand.<no memory space> [shape: f32[1], index: 2, kind: input, shape index: {}]   ;;  %s154_s3 = inlined_call_operand.hbm [shape: f32[2,2], index: 3, kind: output, shape index: {}]  }
   0x1   :  { %v16_v0 = vld [vmem:[%s151_s0] sm:$0x3]  ;;  %78 = vset.pattern.permute.xlu0 %v106_v1  ;;  %80 = vset.pattern.permute.xlu1 %v107_v2 }
   0x2   :  { %9 = vsyncpa [#allocation4], 0  ;;  %25 = vperm.xlu0 %78, %v16_v0   ;;  %45 = vperm.xlu1 %80, %v16_v0   ;;  %v108_v3 = vmov 1   ;;  %v19_v4 = vlaneseq  ;;  %v17_v7 = vld [vmem:[%s152_s1] sm:$0xf]  ;;  %v55_v23 = vstv %s153_s2  ;;  %s109_s1 = smov [#allocation3]  }
   0x3   :  { %s66_s17 = sshll.u32 %s109_s1, 4  ;;  %vm58_vm1 = vcmask 9216   ;;  %s67_s17 = int_to_ptr.vmem [resolvable:$true] %s66_s17 }
   0x4   :  { %v20_v5 = vshrl.u32 %v19_v4, 7  ;;  %s82_s18 = scalar_lea.vmem %s67_s17, 32  ;;  %p87_p1 = scmp.lt.s32.totalorder %s67_s17, %s67_s17 }
   0x5   :  { %p83_p0 = scmp.ne.s32.totalorder %s67_s17, %s82_s18  ;;  %p88_p2 = scmp.lt.s32.totalorder %s82_s18, %s82_s18 }
   0x6   :  { %79 = vset.pattern.permute.xlu0 %v108_v3  ;;  %v30_v6 = vsub.s32 0, %v20_v5  ;;  %v21_v8 = vsub.s32 3, %v20_v5  ;;  %v40_v10 = vsub.s32 1, %v20_v5  ;;  %v50_v11 = vsub.s32 2, %v20_v5 }
   0x7   :  { %35 = vperm.xlu0 %79, %v16_v0   ;;  %p89_p3 = por %p88_p2, %p87_p1 }
   0x8   :  { %v31_v9 = vrot.slane %v17_v7, %v30_v6  ;;  %v22_v13 = vrot.slane %v17_v7, %v21_v8  ;;  %v41_v15 = vrot.slane %v17_v7, %v40_v10  ;;  %v51_v16 = vrot.slane %v17_v7, %v50_v11 }
   0x9   :  { %p90_p4 = pnand %p89_p3, %p83_p0 }
   0xb   :  { %81 = vset.pattern.permute.xlu0 %v107_v2 }
  0x81   :  { %v26_v12 = vpop.permute.xlu0 %25  ;;  %v46_v17 = vpop.permute.xlu1 %45 }
  0x82   :  { %v32_v14 = vmul.f32 %v31_v9, %v26_v12  ;;  %v52_v21 = vmul.f32 %v51_v16, %v46_v17 }
  0x84   :  { %v33_v19 = vadd.f32 %v32_v14, %v22_v13 }
  0x86   :  { %v36_v18 = vpop.permute.xlu0 %35 }
  0x87   :  { %v42_v20 = vmul.f32 %v41_v15, %v36_v18 }
  0x89   :  { %v43_v22 = vadd.f32 %v42_v20, %v33_v19 }
  0x8b   :  { %v53_v24 = vadd.f32 %v52_v21, %v43_v22 }
  0x8d   :  { %v56_v25 = vmul.f32 %v55_v23, %v53_v24  ;;  %vm54_vm0 = vcmp.ge.f32.partialorder %v53_v24, 0.0 }
  0x8f   :  { %v57_v26 = vsel %vm54_vm0, %v53_v24, %v56_v25 }
  0x90   :  { %59 = vst.msk [vmem:[#allocation3] sm:$0x3] %vm58_vm1, %v57_v26 }
  0x91   :  { %93 = shalt.err (!%p90_p4)
}
  0x92   :  { %s94_s2 = scalar_lea.hbm %s154_s3, 32 }
  0x93   :  { %p95_p5 = scmp.ne.s32.totalorder %s154_s3, %s94_s2  ;;  %p98_p6 = scmp.lt.u32.totalorder %s94_s2, %s154_s3 }
  0x95   :  { %p100_p7 = pnand %p98_p6, %p95_p5 }
  0x97   :  { %103 = shalt.err (!%p100_p7)
}
  0x98   :  { %69 = dma.vmem_to_hbm [thread:$0]  %s67_s17, 32, %s154_s3, [#allocation4]  }
  0x99   :  { %104 = dma.done.wait [#allocation4], 32  }
  0x9a   :  { %105 = vsyncadd [#allocation4], 4294967264 }
  0x9b   :  { %73 = vsyncpa [#allocation4], 1 }

</bundles_post_ra>
